<compile_context>
chip_gen: v7x
topology: tpu7x:2x2x1
jax: 0.10.0
libtpu: 0.0.40
codegen_flags: <defaults>
</compile_context>

<pallas_src>
import functools

import jax
import jax.numpy as jnp
from jax.experimental import pallas as pl
from jax.experimental.pallas import tpu as pltpu


def _layernorm(x, gamma, beta, eps=1e-5):
    mu = jnp.mean(x, axis=-1, keepdims=True)
    var = jnp.mean((x - mu) ** 2, axis=-1, keepdims=True)
    return (x - mu) * jax.lax.rsqrt(var + eps) * gamma + beta


def _encoder_kernel(ids_ref, word_ref, pos_ref, wfc_ref, w1_ref, w2_ref,
                    vecs_ref, b1_ref, out_ref, *, N, L, E, H, hd, V):
    f32 = jnp.float32
    bf16 = jnp.bfloat16
    T = N * L  # tokens, row index t = n*L + l

    # ---- fused embedding: one-hot @ word_emb (exact in f32) + positional rows ----
    # TODO(synk): for large vocab keep the gather outside or use a DMA row-gather; at
    # VOCAB=100 the whole table is VMEM-resident and a one-hot MXU matmul is exact.
    ids = ids_ref[...]                                                    # (T, 1) int32
    onehot = (ids == jax.lax.broadcasted_iota(jnp.int32, (T, V), 1)).astype(f32)
    tok = jnp.dot(onehot, word_ref[...], preferred_element_type=f32)      # (T, E)
    pos = jnp.concatenate([pos_ref[...]] * N, axis=0)                     # (T, E)
    x = tok + pos                                                         # dropout = identity

    # ---- multi-head self-attention, (head, batch) folded into one einsum batch axis ----
    # TODO(synk): mask=None and dropout=identity are baked in (matches Encoder usage here).
    scale = 1.0 / jnp.sqrt(jnp.float32(E))          # reference scales by sqrt(embed_size)
    xh = jnp.concatenate(
        [x[:, h * hd:(h + 1) * hd].reshape(N, L, hd) for h in range(H)],
        axis=0)                                                            # (H*N, L, hd)
    q = (xh * scale).astype(bf16)                   # fold 1/sqrt(E) into q (cheaper than L*L)
    kv = xh.astype(bf16)

    energy = jnp.einsum("bqd,bkd->bqk", q, kv, preferred_element_type=f32)  # (H*N, L, L)
    energy = energy - jnp.max(energy, axis=-1, keepdims=True)
    p = jnp.exp(energy)
    p = p / jnp.sum(p, axis=-1, keepdims=True)      # exact softmax normalization (f32)
    attn = jnp.einsum("bqk,bkd->bqd", p.astype(bf16), kv,
                      preferred_element_type=f32)                           # (H*N, L, hd)

    # concat heads back along features, then ONE fc_out matmul (== concat(heads) @ Wfc)
    attn_cat = jnp.concatenate(
        [attn[h * N:(h + 1) * N].reshape(T, hd) for h in range(H)], axis=-1)  # (T, E)

    vecs = vecs_ref[...]                            # (6, E): [bfc, g1, be1, b2, g2, be2]
    attn_out = jnp.dot(attn_cat.astype(bf16), wfc_ref[...],
                       preferred_element_type=f32) + vecs[0:1, :]           # (T, E)

    # ---- residual + LayerNorm1, feed-forward, residual + LayerNorm2 (f32 elementwise) ----
    y = _layernorm(attn_out + x, vecs[1:2, :], vecs[2:3, :])
    h1 = jnp.dot(y.astype(bf16), w1_ref[...], preferred_element_type=f32) + b1_ref[...]
    h1 = jnp.maximum(h1, 0.0)
    ff = jnp.dot(h1.astype(bf16), w2_ref[...], preferred_element_type=f32) + vecs[3:4, :]
    out = _layernorm(ff + y, vecs[4:5, :], vecs[5:6, :])

    # NOTE: with E=32 the store is lane-masked; at production E keep the output's last dim
    # a multiple of 128 (lane-dense) — biggest measured store-side lever.
    out_ref[...] = out.reshape(N, L, E).astype(out_ref.dtype)


def encoder_forward(token_ids, params, *, heads):
    """Encoder.forward: word + positional embedding, dropout(=identity), one TransformerBlock."""
    N, L = token_ids.shape
    V, E = params["word_emb"].shape
    hd = E // heads

    ids = token_ids.reshape(N * L, 1).astype(jnp.int32)
    pos = params["pos_emb"][:L]
    # matmul weights as bf16 MXU operands (f32 accumulate); everything else stays f32
    wfc = params["wfc"].astype(jnp.bfloat16)
    w1 = params["w1"].astype(jnp.bfloat16)
    w2 = params["w2"].astype(jnp.bfloat16)
    # stack the six E-sized bias/gamma/beta vectors into one ref: [bfc, g1, be1, b2, g2, be2]
    vecs = jnp.concatenate([params["bfc"], params["g1"], params["be1"],
                            params["b2"], params["g2"], params["be2"]], axis=0)

    kernel = functools.partial(_encoder_kernel, N=N, L=L, E=E, H=heads, hd=hd, V=V)
    vmem = pl.BlockSpec(memory_space=pltpu.MemorySpace.VMEM)

    # Single invocation (no grid): the whole problem fits comfortably in VMEM, so a multi-step
    # grid would only add fixed per-step overhead.  Re-introduce a ("parallel",) batch axis,
    # kv-tiled online softmax and F-tiled FFN (budgeted for v7x's 64 MiB VMEM) once L/E grow.
    return pl.pallas_call(
        kernel,
        out_shape=jax.ShapeDtypeStruct((N, L, E), jnp.float32),
        in_specs=[vmem] * 8,
        out_specs=vmem,
    )(ids, params["word_emb"], pos, wfc, w1, w2, vecs, params["b1"])


def _reference_encoder(token_ids, params, *, heads):
    """Pure-JAX f32 reference matching the PyTorch forward (mask=None, dropout=identity)."""
    N, L = token_ids.shape
    E = params["word_emb"].shape[1]
    hd = E // heads
    x = params["word_emb"][token_ids] + params["pos_emb"][:L][None, :, :]
    q = x.reshape(N, L, heads, hd)
    energy = jnp.einsum("nqhd,nkhd->nhqk", q, q)
    attn = jax.nn.softmax(energy / jnp.sqrt(jnp.float32(E)), axis=3)
    out = jnp.einsum("nhql,nlhd->nqhd", attn, q).reshape(N, L, E)
    out = out @ params["wfc"] + params["bfc"]
    y = _layernorm(out + x, params["g1"], params["be1"])
    ff = jnp.maximum(y @ params["w1"] + params["b1"], 0.0) @ params["w2"] + params["b2"]
    return _layernorm(ff + y, params["g2"], params["be2"])


if __name__ == "__main__":
    # Small config: vocab=100, max_length=64, embed_size=32, heads=4, seq=8, batch=2,
    # forward_expansion=2, dropout ignored (inference).
    N, L, E, HEADS, FE = 2, 8, 32, 4, 2
    VOCAB, MAX_LEN = 100, 64
    F = FE * E

    root = jax.random.PRNGKey(0)
    ks = jax.random.split(root, 12)

    token_ids = jax.random.randint(ks[0], (N, L), 0, VOCAB, dtype=jnp.int32)

    params = {
        "word_emb": 0.5 * jax.random.normal(ks[1], (VOCAB, E), jnp.float32),
        "pos_emb":  0.5 * jax.random.normal(ks[2], (MAX_LEN, E), jnp.float32),
        "wfc": 0.1 * jax.random.normal(ks[3], (E, E), jnp.float32),
        "bfc": 0.1 * jax.random.normal(ks[4], (1, E), jnp.float32),
        "g1":  jnp.ones((1, E), jnp.float32),
        "be1": jnp.zeros((1, E), jnp.float32),
        "w1":  0.1 * jax.random.normal(ks[5], (E, F), jnp.float32),
        "b1":  0.1 * jax.random.normal(ks[6], (1, F), jnp.float32),
        "w2":  0.1 * jax.random.normal(ks[7], (F, E), jnp.float32),
        "b2":  0.1 * jax.random.normal(ks[8], (1, E), jnp.float32),
        "g2":  jnp.ones((1, E), jnp.float32),
        "be2": jnp.zeros((1, E), jnp.float32),
    }

    out = encoder_forward(token_ids, params, heads=HEADS)
    out = jax.block_until_ready(out)

    ref = _reference_encoder(token_ids, params, heads=HEADS)
    assert out.shape == (N, L, E)
    # Kernel uses bf16 matmul operands with f32 accumulation; tolerance covers bf16 rounding.
    max_err = float(jnp.max(jnp.abs(out - ref)))
    assert jnp.allclose(out, ref, atol=3e-2, rtol=3e-2), f"mismatch vs reference (max abs err {max_err})"

    print("KERNEL_OK")
</pallas_src>

<mosaic_0001>
module attributes {stable_mosaic.version = 11 : i64} {
  func.func @_encoder_kernel(%arg0: memref<16x1xi32, #tpu.memory_space<vmem>>, %arg1: memref<100x32xf32, #tpu.memory_space<vmem>>, %arg2: memref<8x32xf32, #tpu.memory_space<vmem>>, %arg3: memref<32x32xbf16, #tpu.memory_space<vmem>>, %arg4: memref<32x64xbf16, #tpu.memory_space<vmem>>, %arg5: memref<64x32xbf16, #tpu.memory_space<vmem>>, %arg6: memref<6x32xf32, #tpu.memory_space<vmem>>, %arg7: memref<1x64xf32, #tpu.memory_space<vmem>>, %arg8: memref<2x8x32xf32, #tpu.memory_space<vmem>>) attributes {dimension_semantics = [], scalar_prefetch = 0 : i64, scratch_operands = 0 : i64, tpu.core_type = #tpu.core_type<tc>} {
    %c0 = arith.constant 0 : index
    %c0_0 = arith.constant 0 : index
    %0 = vector.load %arg0[%c0, %c0_0] : memref<16x1xi32, #tpu.memory_space<vmem>>, vector<16x1xi32>
    %1 = tpu.iota {dimensions = array<i32: 1>} : vector<16x100xi32>
    %2 = vector.broadcast %0 : vector<16x1xi32> to vector<16x100xi32>
    %3 = arith.cmpi eq, %2, %1 : vector<16x100xi32>
    %4 = arith.extui %3 : vector<16x100xi1> to vector<16x100xi32>
    %5 = arith.sitofp %4 : vector<16x100xi32> to vector<16x100xf32>
    %c0_1 = arith.constant 0 : index
    %c0_2 = arith.constant 0 : index
    %6 = vector.load %arg1[%c0_1, %c0_2] : memref<100x32xf32, #tpu.memory_space<vmem>>, vector<100x32xf32>
    %cst = arith.constant dense<0.000000e+00> : vector<16x32xf32>
    %7 = tpu.matmul %5, %6, %cst {dimension_numbers = #tpu.dot_dimension_numbers<[1], [0], [0], [1], [0, 0, 1, 1], [], []>} : vector<16x100xf32>, vector<100x32xf32>, vector<16x32xf32> -> vector<16x32xf32>
    %c0_3 = arith.constant 0 : index
    %c0_4 = arith.constant 0 : index
    %8 = vector.load %arg2[%c0_3, %c0_4] : memref<8x32xf32, #tpu.memory_space<vmem>>, vector<8x32xf32>
    %9 = tpu.concatenate %8, %8 in 0 : vector<8x32xf32>, vector<8x32xf32> -> vector<16x32xf32>
    %10 = arith.addf %7, %9 : vector<16x32xf32>
    %cst_5 = arith.constant 3.200000e+01 : f32
    %11 = math.sqrt %cst_5 : f32
    %cst_6 = arith.constant 1.000000e+00 : f32
    %12 = arith.divf %cst_6, %11 : f32
    %13 = vector.extract_strided_slice %10 {offsets = [0, 0], sizes = [16, 8], strides = [1, 1]} : vector<16x32xf32> to vector<16x8xf32>
    %14 = vector.shape_cast %13 : vector<16x8xf32> to vector<2x8x8xf32>
    %15 = vector.extract_strided_slice %10 {offsets = [0, 8], sizes = [16, 8], strides = [1, 1]} : vector<16x32xf32> to vector<16x8xf32>
    %16 = vector.shape_cast %15 : vector<16x8xf32> to vector<2x8x8xf32>
    %17 = vector.extract_strided_slice %10 {offsets = [0, 16], sizes = [16, 8], strides = [1, 1]} : vector<16x32xf32> to vector<16x8xf32>
    %18 = vector.shape_cast %17 : vector<16x8xf32> to vector<2x8x8xf32>
    %19 = vector.extract_strided_slice %10 {offsets = [0, 24], sizes = [16, 8], strides = [1, 1]} : vector<16x32xf32> to vector<16x8xf32>
    %20 = vector.shape_cast %19 : vector<16x8xf32> to vector<2x8x8xf32>
    %21 = tpu.concatenate %14, %16, %18, %20 in 0 : vector<2x8x8xf32>, vector<2x8x8xf32>, vector<2x8x8xf32>, vector<2x8x8xf32> -> vector<8x8x8xf32>
    %22 = vector.broadcast %12 : f32 to vector<8x8x8xf32>
    %23 = arith.mulf %21, %22 : vector<8x8x8xf32>
    %24 = arith.truncf %23 : vector<8x8x8xf32> to vector<8x8x8xbf16>
    %25 = arith.truncf %21 : vector<8x8x8xf32> to vector<8x8x8xbf16>
    "tpu.trace_start"() <{level = 10 : i32, message = "bqd,bkd->bqk"}> : () -> ()
    %cst_7 = arith.constant dense<0.000000e+00> : vector<8x8x8xf32>
    %26 = tpu.matmul %24, %25, %cst_7 {dimension_numbers = #tpu.dot_dimension_numbers<[2], [2], [1], [1], [0, 0, 0, 1, 1, 1], [0], [0]>} : vector<8x8x8xbf16>, vector<8x8x8xbf16>, vector<8x8x8xf32> -> vector<8x8x8xf32>
    "tpu.trace_stop"() : () -> ()
    %cst_8 = arith.constant dense<0xFF800000> : vector<8x8xf32>
    %27 = vector.multi_reduction <maximumf>, %26, %cst_8 [2] : vector<8x8x8xf32> to vector<8x8xf32>
    %28 = vector.shape_cast %27 : vector<8x8xf32> to vector<8x8x1xf32>
    %29 = vector.broadcast %28 : vector<8x8x1xf32> to vector<8x8x8xf32>
    %30 = arith.subf %26, %29 : vector<8x8x8xf32>
    %31 = math.exp %30 : vector<8x8x8xf32>
    %cst_9 = arith.constant dense<0.000000e+00> : vector<8x8xf32>
    %32 = vector.multi_reduction <add>, %31, %cst_9 [2] : vector<8x8x8xf32> to vector<8x8xf32>
    %33 = vector.shape_cast %32 : vector<8x8xf32> to vector<8x8x1xf32>
    %34 = vector.broadcast %33 : vector<8x8x1xf32> to vector<8x8x8xf32>
    %35 = arith.divf %31, %34 : vector<8x8x8xf32>
    %36 = arith.truncf %35 : vector<8x8x8xf32> to vector<8x8x8xbf16>
    "tpu.trace_start"() <{level = 10 : i32, message = "bqk,bkd->bqd"}> : () -> ()
    %cst_10 = arith.constant dense<0.000000e+00> : vector<8x8x8xf32>
    %37 = tpu.matmul %36, %25, %cst_10 {dimension_numbers = #tpu.dot_dimension_numbers<[2], [1], [1], [2], [0, 0, 0, 1, 1, 2], [0], [0]>} : vector<8x8x8xbf16>, vector<8x8x8xbf16>, vector<8x8x8xf32> -> vector<8x8x8xf32>
    "tpu.trace_stop"() : () -> ()
    %38 = vector.extract_strided_slice %37 {offsets = [0, 0, 0], sizes = [2, 8, 8], strides = [1, 1, 1]} : vector<8x8x8xf32> to vector<2x8x8xf32>
    %39 = vector.shape_cast %38 : vector<2x8x8xf32> to vector<16x8xf32>
    %40 = vector.extract_strided_slice %37 {offsets = [2, 0, 0], sizes = [2, 8, 8], strides = [1, 1, 1]} : vector<8x8x8xf32> to vector<2x8x8xf32>
    %41 = vector.shape_cast %40 : vector<2x8x8xf32> to vector<16x8xf32>
    %42 = vector.extract_strided_slice %37 {offsets = [4, 0, 0], sizes = [2, 8, 8], strides = [1, 1, 1]} : vector<8x8x8xf32> to vector<2x8x8xf32>
    %43 = vector.shape_cast %42 : vector<2x8x8xf32> to vector<16x8xf32>
    %44 = vector.extract_strided_slice %37 {offsets = [6, 0, 0], sizes = [2, 8, 8], strides = [1, 1, 1]} : vector<8x8x8xf32> to vector<2x8x8xf32>
    %45 = vector.shape_cast %44 : vector<2x8x8xf32> to vector<16x8xf32>
    %46 = tpu.concatenate %39, %41, %43, %45 in 1 : vector<16x8xf32>, vector<16x8xf32>, vector<16x8xf32>, vector<16x8xf32> -> vector<16x32xf32>
    %c0_11 = arith.constant 0 : index
    %c0_12 = arith.constant 0 : index
    %47 = vector.load %arg6[%c0_11, %c0_12] : memref<6x32xf32, #tpu.memory_space<vmem>>, vector<6x32xf32>
    %48 = arith.truncf %46 : vector<16x32xf32> to vector<16x32xbf16>
    %c0_13 = arith.constant 0 : index
    %c0_14 = arith.constant 0 : index
    %49 = vector.load %arg3[%c0_13, %c0_14] : memref<32x32xbf16, #tpu.memory_space<vmem>>, vector<32x32xbf16>
    %cst_15 = arith.constant dense<0.000000e+00> : vector<16x32xf32>
    %50 = tpu.matmul %48, %49, %cst_15 {dimension_numbers = #tpu.dot_dimension_numbers<[1], [0], [0], [1], [0, 0, 1, 1], [], []>} : vector<16x32xbf16>, vector<32x32xbf16>, vector<16x32xf32> -> vector<16x32xf32>
    %51 = vector.extract_strided_slice %47 {offsets = [0, 0], sizes = [1, 32], strides = [1, 1]} : vector<6x32xf32> to vector<1x32xf32>
    %52 = vector.broadcast %51 : vector<1x32xf32> to vector<16x32xf32>
    %53 = arith.addf %50, %52 : vector<16x32xf32>
    %54 = arith.addf %53, %10 : vector<16x32xf32>
    %55 = vector.extract_strided_slice %47 {offsets = [1, 0], sizes = [1, 32], strides = [1, 1]} : vector<6x32xf32> to vector<1x32xf32>
    %56 = vector.extract_strided_slice %47 {offsets = [2, 0], sizes = [1, 32], strides = [1, 1]} : vector<6x32xf32> to vector<1x32xf32>
    %cst_16 = arith.constant dense<0.000000e+00> : vector<16xf32>
    %57 = vector.multi_reduction <add>, %54, %cst_16 [1] : vector<16x32xf32> to vector<16xf32>
    %58 = vector.shape_cast %57 : vector<16xf32> to vector<16x1xf32>
    %cst_17 = arith.constant 3.200000e+01 : f32
    %59 = vector.broadcast %cst_17 : f32 to vector<16x1xf32>
    %60 = arith.divf %58, %59 : vector<16x1xf32>
    %61 = vector.broadcast %60 : vector<16x1xf32> to vector<16x32xf32>
    %62 = arith.subf %54, %61 : vector<16x32xf32>
    %63 = arith.mulf %62, %62 : vector<16x32xf32>
    %cst_18 = arith.constant dense<0.000000e+00> : vector<16xf32>
    %64 = vector.multi_reduction <add>, %63, %cst_18 [1] : vector<16x32xf32> to vector<16xf32>
    %65 = vector.shape_cast %64 : vector<16xf32> to vector<16x1xf32>
    %cst_19 = arith.constant 3.200000e+01 : f32
    %66 = vector.broadcast %cst_19 : f32 to vector<16x1xf32>
    %67 = arith.divf %65, %66 : vector<16x1xf32>
    %68 = vector.broadcast %60 : vector<16x1xf32> to vector<16x32xf32>
    %69 = arith.subf %54, %68 : vector<16x32xf32>
    %cst_20 = arith.constant 9.99999974E-6 : f32
    %70 = vector.broadcast %cst_20 : f32 to vector<16x1xf32>
    %71 = arith.addf %67, %70 : vector<16x1xf32>
    %72 = math.rsqrt %71 : vector<16x1xf32>
    %73 = vector.broadcast %72 : vector<16x1xf32> to vector<16x32xf32>
    %74 = arith.mulf %69, %73 : vector<16x32xf32>
    %75 = vector.broadcast %55 : vector<1x32xf32> to vector<16x32xf32>
    %76 = arith.mulf %74, %75 : vector<16x32xf32>
    %77 = vector.broadcast %56 : vector<1x32xf32> to vector<16x32xf32>
    %78 = arith.addf %76, %77 : vector<16x32xf32>
    %79 = arith.truncf %78 : vector<16x32xf32> to vector<16x32xbf16>
    %c0_21 = arith.constant 0 : index
    %c0_22 = arith.constant 0 : index
    %80 = vector.load %arg4[%c0_21, %c0_22] : memref<32x64xbf16, #tpu.memory_space<vmem>>, vector<32x64xbf16>
    %cst_23 = arith.constant dense<0.000000e+00> : vector<16x64xf32>
    %81 = tpu.matmul %79, %80, %cst_23 {dimension_numbers = #tpu.dot_dimension_numbers<[1], [0], [0], [1], [0, 0, 1, 1], [], []>} : vector<16x32xbf16>, vector<32x64xbf16>, vector<16x64xf32> -> vector<16x64xf32>
    %c0_24 = arith.constant 0 : index
    %c0_25 = arith.constant 0 : index
    %82 = vector.load %arg7[%c0_24, %c0_25] : memref<1x64xf32, #tpu.memory_space<vmem>>, vector<1x64xf32>
    %83 = vector.broadcast %82 : vector<1x64xf32> to vector<16x64xf32>
    %84 = arith.addf %81, %83 : vector<16x64xf32>
    %cst_26 = arith.constant 0.000000e+00 : f32
    %85 = vector.broadcast %cst_26 : f32 to vector<16x64xf32>
    %86 = arith.maximumf %84, %85 : vector<16x64xf32>
    %87 = arith.truncf %86 : vector<16x64xf32> to vector<16x64xbf16>
    %c0_27 = arith.constant 0 : index
    %c0_28 = arith.constant 0 : index
    %88 = vector.load %arg5[%c0_27, %c0_28] : memref<64x32xbf16, #tpu.memory_space<vmem>>, vector<64x32xbf16>
    %cst_29 = arith.constant dense<0.000000e+00> : vector<16x32xf32>
    %89 = tpu.matmul %87, %88, %cst_29 {dimension_numbers = #tpu.dot_dimension_numbers<[1], [0], [0], [1], [0, 0, 1, 1], [], []>} : vector<16x64xbf16>, vector<64x32xbf16>, vector<16x32xf32> -> vector<16x32xf32>
    %90 = vector.extract_strided_slice %47 {offsets = [3, 0], sizes = [1, 32], strides = [1, 1]} : vector<6x32xf32> to vector<1x32xf32>
    %91 = vector.broadcast %90 : vector<1x32xf32> to vector<16x32xf32>
    %92 = arith.addf %89, %91 : vector<16x32xf32>
    %93 = arith.addf %92, %78 : vector<16x32xf32>
    %94 = vector.extract_strided_slice %47 {offsets = [4, 0], sizes = [1, 32], strides = [1, 1]} : vector<6x32xf32> to vector<1x32xf32>
    %95 = vector.extract_strided_slice %47 {offsets = [5, 0], sizes = [1, 32], strides = [1, 1]} : vector<6x32xf32> to vector<1x32xf32>
    %cst_30 = arith.constant dense<0.000000e+00> : vector<16xf32>
    %96 = vector.multi_reduction <add>, %93, %cst_30 [1] : vector<16x32xf32> to vector<16xf32>
    %97 = vector.shape_cast %96 : vector<16xf32> to vector<16x1xf32>
    %cst_31 = arith.constant 3.200000e+01 : f32
    %98 = vector.broadcast %cst_31 : f32 to vector<16x1xf32>
    %99 = arith.divf %97, %98 : vector<16x1xf32>
    %100 = vector.broadcast %99 : vector<16x1xf32> to vector<16x32xf32>
    %101 = arith.subf %93, %100 : vector<16x32xf32>
    %102 = arith.mulf %101, %101 : vector<16x32xf32>
    %cst_32 = arith.constant dense<0.000000e+00> : vector<16xf32>
    %103 = vector.multi_reduction <add>, %102, %cst_32 [1] : vector<16x32xf32> to vector<16xf32>
    %104 = vector.shape_cast %103 : vector<16xf32> to vector<16x1xf32>
    %cst_33 = arith.constant 3.200000e+01 : f32
    %105 = vector.broadcast %cst_33 : f32 to vector<16x1xf32>
    %106 = arith.divf %104, %105 : vector<16x1xf32>
    %107 = vector.broadcast %99 : vector<16x1xf32> to vector<16x32xf32>
    %108 = arith.subf %93, %107 : vector<16x32xf32>
    %cst_34 = arith.constant 9.99999974E-6 : f32
    %109 = vector.broadcast %cst_34 : f32 to vector<16x1xf32>
    %110 = arith.addf %106, %109 : vector<16x1xf32>
    %111 = math.rsqrt %110 : vector<16x1xf32>
    %112 = vector.broadcast %111 : vector<16x1xf32> to vector<16x32xf32>
    %113 = arith.mulf %108, %112 : vector<16x32xf32>
    %114 = vector.broadcast %94 : vector<1x32xf32> to vector<16x32xf32>
    %115 = arith.mulf %113, %114 : vector<16x32xf32>
    %116 = vector.broadcast %95 : vector<1x32xf32> to vector<16x32xf32>
    %117 = arith.addf %115, %116 : vector<16x32xf32>
    %118 = vector.shape_cast %117 : vector<16x32xf32> to vector<2x8x32xf32>
    %c0_35 = arith.constant 0 : index
    %c0_36 = arith.constant 0 : index
    %c0_37 = arith.constant 0 : index
    %119 = vector.load %arg8[%c0_35, %c0_36, %c0_37] : memref<2x8x32xf32, #tpu.memory_space<vmem>>, vector<2x8x32xf32>
    tpu.vector_store %arg8[%c0_35, %c0_36, %c0_37], %118 {strides = array<i32>} : memref<2x8x32xf32, #tpu.memory_space<vmem>>, vector<2x8x32xf32>,
    return
  }
}

</mosaic_0001>

<bundles_post_ra>
// kernel: tpu_custom_call.1
= control target key start
LH: loop header
LB: loop body
LE: loop exit
PB: predicated region body
PF: predicated region fallthrough
CT: control target
= control target key end

     0   :  { %v1733_v2 = vmov 0   ;;  %v1734_v11 = vmov 0.0   ;;  %s2089_s0 = inlined_call_operand.vmem [shape: s32[16,1], index: 0, kind: input, shape index: {}]   ;;  %s2090_s1 = inlined_call_operand.vmem [shape: f32[100,32], index: 1, kind: input, shape index: {}]   ;;  %s2091_s2 = inlined_call_operand.vmem [shape: f32[8,32], index: 2, kind: input, shape index: {}]   ;;  %s2092_s3 = inlined_call_operand.vmem [shape: bf16[32,32], index: 3, kind: input, shape index: {}]   ;;  %s2093_s4 = inlined_call_operand.vmem [shape: bf16[32,64], index: 4, kind: input, shape index: {}]   ;;  %s2094_s5 = inlined_call_operand.vmem [shape: bf16[64,32], index: 5, kind: input, shape index: {}]   ;;  %s2095_s6 = inlined_call_operand.vmem [shape: f32[6,32], index: 6, kind: input, shape index: {}]   ;;  %s2096_s7 = inlined_call_operand.vmem [shape: f32[1,64], index: 7, kind: input, shape index: {}]   ;;  %s2097_s8 = inlined_call_operand.hbm [shape: f32[2,8,32], index: 8, kind: output, shape index: {}]  }
   0x1   :  { %v31_v0 = vld [vmem:[%s2089_s0] sm:$0xff]  ;;  %1645 = vset.pattern.permute.xlu0 %v1733_v2  ;;  %v48_v3 = vld [vmem:[%s2090_s1 + $0x8] sm:$0xff]  ;;  %v49_v4 = vld [vmem:[%s2090_s1 + $0x10] sm:$0xff]  ;;  %1486 = vmatprep.subr.bf16.mxu1 %v1734_v11 }
   0x2   :  { %v47_v1 = vld [vmem:[%s2090_s1] sm:$0xff]  ;;  %v50_v5 = vld [vmem:[%s2090_s1 + $0x18] sm:$0xff]  ;;  %36 = vperm.xlu0 %1645, %v31_v0   ;;  %v32_v8 = vld [vmem:[%s2089_s0 + $0x8] sm:$0xff] }
   0x3   :  { %v1610_v6 = vpack.c.bf16 %v48_v3, %v47_v1  ;;  %v1614_v7 = vpack.c.bf16 %v50_v5, %v49_v4  ;;  %v51_v9 = vld [vmem:[%s2090_s1 + $0x20] sm:$0xff]  ;;  %v52_v10 = vld [vmem:[%s2090_s1 + $0x28] sm:$0xff]  ;;  %v53_v12 = vld [vmem:[%s2090_s1 + $0x30] sm:$0xff] }
   0x4   :  { %v54_v13 = vld [vmem:[%s2090_s1 + $0x38] sm:$0xff]  ;;  %v1618_v14 = vpack.c.bf16 %v52_v10, %v51_v9 }
   0x5   :  { %1611 = vmatprep.subr.bf16.mxu0 %v1610_v6  ;;  %v1622_v15 = vpack.c.bf16 %v54_v13, %v53_v12 }
   0x6   :  { %1613 = vmatpush3.bf16.msra.mxu0 %v1610_v6  ;;  %39 = vperm.xlu0 %1645, %v32_v8  }
   0x7   :  { %1615 = vmatprep.subr.bf16.mxu0 %v1614_v7 }
   0xa   :  { %1617 = vmatpush3.bf16.msra.mxu0 %v1614_v7 }
   0xb   :  { %1619 = vmatprep.subr.bf16.mxu0 %v1618_v14 }
   0xc   :  { %13 = vsyncpa [#allocation3], 0  ;;  %v55_v16 = vld [vmem:[%s2090_s1 + $0x40] sm:$0xff]  ;;  %v56_v17 = vld [vmem:[%s2090_s1 + $0x48] sm:$0xff]  ;;  %vm68_vm0 = vcmask 1043456   ;;  %v33_v23 = vlaneseq  ;;  %vm61_vm1 = vcmask 818176  }
   0xd   :  { %v1626_v18 = vpack.c.bf16 %v56_v17, %v55_v16  ;;  %v57_v19 = vld [vmem:[%s2090_s1 + $0x50] sm:$0xff]  ;;  %v58_v20 = vld [vmem:[%s2090_s1 + $0x58] sm:$0xff]  ;;  %v59_v22 = vld [vmem:[%s2090_s1 + $0x60] sm:$0xf]  ;;  %vm1735_vm4 = vmmov 0   ;;  %vm191_vm5 = vcmask 64512  }
   0xe   :  { %1621 = vmatpush3.bf16.msra.mxu0 %v1618_v14  ;;  %v1630_v21 = vpack.c.bf16 %v58_v20, %v57_v19  ;;  %v34_v24 = vand.u32 127, %v33_v23  ;;  %1488 = vmatprep.mubr.msk.bf16.mxu1 %vm1735_vm4, %v1734_v11  ;;  %v60_v29 = vld [vmem:[%s2091_s2] sm:$0xff]  ;;  %s1736_s13 = smov 112   ;;  %s1737_s14 = smov 120   ;;  %vm1042_vm6 = vcmask 130048   ;;  %vm1045_vm7 = vcmask 195584  }
   0xf   :  { %1623 = vmatprep.subr.bf16.mxu0 %v1622_v15  ;;  %s1738_s2 = smov 104   ;;  %s1739_s15 = smov 8   ;;  %vm1070_vm8 = vcmask 261120   ;;  %vm1263_vm9 = vcmask 523264  }
  0x10   :  { %s1740_s20 = smov 16   ;;  %s1741_s21 = smov 24  }
  0x12   :  { %1625 = vmatpush3.bf16.msra.mxu0 %v1622_v15 }
  0x13   :  { %1627 = vmatprep.subr.bf16.mxu0 %v1626_v18 }
  0x16   :  { %1629 = vmatpush3.bf16.msra.mxu0 %v1626_v18 }
  0x17   :  { %1631 = vmatprep.subr.bf16.mxu0 %v1630_v21 }
  0x1a   :  { %1633 = vmatpush3.bf16.msra.mxu0 %v1630_v21 }
  0x1b   :  { %1481 = vmatprep.subr.msk.mxu0 %vm68_vm0, %v59_v22 }
  0x1e   :  { %1482 = vmatpush3.msk.msra.mxu0 %vm68_vm0, %v59_v22 }
  0x1f   :  { %1522 = vmatprep.subr.bf16.mxu0 %v1734_v11 }
  0x81   :  { %v37_v25 = vpop.permute.xlu0 %36 }
  0x82   :  { %vm41_vm2 = vcmp.eq.s32.totalorder %v37_v25, %v34_v24 }
  0x83   :  { %v1366_v26 = vsel %vm41_vm2, 1.0, %v1734_v11 }
  0x84   :  { %1483 = vmatprep.mubr.msk.f32.mxu0 %vm61_vm1, %v1366_v26 }
  0x85   :  { %v40_v27 = vpop.permute.xlu0 %39 }
  0x86   :  { %vm42_vm3 = vcmp.eq.s32.totalorder %v40_v27, %v34_v24 }
  0x87   :  { %v1367_v28 = vsel %vm42_vm3, 1.0, %v1734_v11 }
  0x88   :  { %1484 = vmatmul.mubr.msk.f32.vlgmr.msra.gmra.mrb[0].mxu0 %vm61_vm1, %v1367_v28 }
  0x89   :  { %1524 = vmatprep.mubr.msk.bf16.mxu0 %vm1735_vm4, %v1734_v11 }
 0x15b   :  { %v1485_v30 = vpop.f32.mrb[0].mxu0 }
 0x15c   :  { %v138_v31 = vpop.f32.mrb[1].mxu0  ;;  %v1854_v34 = vadd.f32 %v1485_v30, %v60_v29 }
 0x15d   :  { %v1848_v32 = vadd.f32 %v138_v31, %v60_v29 }
 0x15e   :  { %v1863_v37 = vpack.c.bf16 %v1854_v34, %v1854_v34  ;;  %v168_v40 = vmul.f32 0.17677669, %v1854_v34 }
 0x15f   :  { %155 = vrot.lane.b32.xlu0 %v1848_v32, %s1736_s13  ;;  %149 = vrot.lane.b32.xlu1 %v1848_v32, %s1737_s14  ;;  %v183_v33 = vpack.c.bf16 %v1848_v32, %v1848_v32  ;;  %v167_v36 = vmul.f32 0.17677669, %v1848_v32 }
 0x160   :  { %v242_v39 = vsel %vm191_vm5, %v1863_v37, 0  ;;  %v176_v41 = vpack.c.bf16 %v168_v40, %v168_v40  ;;  %v704_v9 = vsel %vm68_vm0, %v1863_v37, 0 }
 0x161   :  { %v196_v35 = vsel %vm191_vm5, %v183_v33, 0  ;;  %v175_v38 = vpack.c.bf16 %v167_v36, %v167_v36  ;;  %v659_v58 = vsel %vm68_vm0, %v183_v33, 0 }
 0x162   :  { %1487 = vmatpush3.bf16.xpose.msra.mxu1 %v196_v35 }
 0x163   :  { %161 = vrot.lane.b32.xlu0 %v1848_v32, %s1738_s2  ;;  %151 = vrot.lane.b32.xlu1 %v1854_v34, %s1737_s14 }
 0x164   :  { %1492 = vmatprep.subr.bf16.mxu1 %v1734_v11 }
 0x167   :  { %157 = vrot.lane.b32.xlu1 %v1854_v34, %s1736_s13 }
 0x169   :  { %1489 = vmatmul.mubr.msk.bf16.vlgmr.msra.gmra.mrb[0].mxu1 %vm191_vm5, %v175_v38 }
 0x16a   :  { %1493 = vmatpush3.bf16.xpose.msra.mxu1 %v242_v39  ;;  %1494 = vmatprep.mubr.msk.bf16.mxu1 %vm1735_vm4, %v1734_v11 }
 0x16b   :  { %163 = vrot.lane.b32.xlu1 %v1854_v34, %s1738_s2  ;;  %1498 = vmatprep.subr.bf16.mxu1 %v1734_v11 }
 0x171   :  { %1495 = vmatmul.mubr.msk.bf16.vlgmr.msra.gmra.mrb[4].mxu1 %vm191_vm5, %v176_v41 }
 0x172   :  { %1500 = vmatprep.mubr.msk.bf16.mxu1 %vm1735_vm4, %v1734_v11 }
 0x1d1   :  { %v156_v42 = vpop.permute.xlu0 %155  ;;  %v150_v43 = vpop.permute.xlu1 %149 }
 0x1d2   :  { %v1877_v44 = vpack.c.bf16 %v150_v43, %v150_v43  ;;  %v169_v48 = vmul.f32 0.17677669, %v150_v43  ;;  %v1895_v57 = vpack.c.bf16 %v156_v42, %v156_v42  ;;  %v171_v62 = vmul.f32 0.17677669, %v156_v42 }
 0x1d4   :  { %v288_v45 = vsel %vm191_vm5, %v1877_v44, 0  ;;  %v177_v52 = vpack.c.bf16 %v169_v48, %v169_v48  ;;  %v380_v60 = vsel %vm191_vm5, %v1895_v57, 0  ;;  %v179_v0 = vpack.c.bf16 %v171_v62, %v171_v62 }
 0x1d5   :  { %v162_v46 = vpop.permute.xlu0 %161  ;;  %v152_v47 = vpop.permute.xlu1 %151  ;;  %1499 = vmatpush3.bf16.xpose.msra.mxu1 %v288_v45 }
 0x1d6   :  { %v1881_v49 = vpack.c.bf16 %v162_v46, %v162_v46  ;;  %1504 = vmatprep.subr.bf16.mxu1 %v1734_v11  ;;  %v1884_v50 = vpack.c.bf16 %v152_v47, %v152_v47  ;;  %v173_v53 = vmul.f32 0.17677669, %v162_v46  ;;  %v170_v56 = vmul.f32 0.17677669, %v152_v47 }
 0x1d8   :  { %v472_v51 = vsel %vm191_vm5, %v1881_v49, 0  ;;  %v334_v54 = vsel %vm191_vm5, %v1884_v50, 0  ;;  %v181_v55 = vpack.c.bf16 %v173_v53, %v173_v53  ;;  %v178_v59 = vpack.c.bf16 %v170_v56, %v170_v56 }
 0x1d9   :  { %1523 = vmatpush3.bf16.xpose.msra.mxu0 %v472_v51  ;;  %v158_v61 = vpop.permute.xlu1 %157 }
 0x1da   :  { %1534 = vmatprep.subr.bf16.mxu0 %v1734_v11  ;;  %v1908_v63 = vpack.c.bf16 %v158_v61, %v158_v61  ;;  %v172_v3 = vmul.f32 0.17677669, %v158_v61 }
 0x1dc   :  { %1501 = vmatmul.mubr.msk.bf16.vlgmr.msra.gmra.mrb[8].mxu1 %vm191_vm5, %v177_v52  ;;  %v426_v1 = vsel %vm191_vm5, %v1908_v63, 0  ;;  %v180_v5 = vpack.c.bf16 %v172_v3, %v172_v3 }
 0x1dd   :  { %1505 = vmatpush3.bf16.xpose.msra.mxu1 %v334_v54  ;;  %1506 = vmatprep.mubr.msk.bf16.mxu1 %vm1735_vm4, %v1734_v11  ;;  %v164_v2 = vpop.permute.xlu1 %163 }
 0x1de   :  { %1510 = vmatprep.subr.bf16.mxu1 %v1734_v11  ;;  %v1916_v4 = vpack.c.bf16 %v164_v2, %v164_v2  ;;  %v174_v7 = vmul.f32 0.17677669, %v164_v2 }
 0x1e0   :  { %1525 = vmatmul.mubr.msk.bf16.vlgmr.msra.gmra.mrb[4].mxu0 %vm191_vm5, %v181_v55  ;;  %v518_v6 = vsel %vm191_vm5, %v1916_v4, 0  ;;  %v182_v8 = vpack.c.bf16 %v174_v7, %v174_v7 }
 0x1e1   :  { %1535 = vmatpush3.bf16.msra.mxu0 %v659_v58  ;;  %1536 = vmatprep.mubr.msk.bf16.mxu0 %vm1735_vm4, %v1734_v11 }
 0x1e2   :  { %1546 = vmatprep.subr.bf16.mxu0 %v1734_v11 }
 0x1e4   :  { %1507 = vmatmul.mubr.msk.bf16.vlgmr.msra.gmra.mrb[12].mxu1 %vm191_vm5, %v178_v59 }
 0x1e5   :  { %1511 = vmatpush3.bf16.xpose.msra.mxu1 %v380_v60  ;;  %1512 = vmatprep.mubr.msk.bf16.mxu1 %vm1735_vm4, %v1734_v11 }
 0x1e6   :  { %1516 = vmatprep.subr.bf16.mxu1 %v1734_v11 }
 0x1ec   :  { %1513 = vmatmul.mubr.msk.bf16.vlgmr.msra.gmra.mrb[16].mxu1 %vm191_vm5, %v179_v0 }
 0x1ed   :  { %1517 = vmatpush3.bf16.xpose.msra.mxu1 %v426_v1  ;;  %1518 = vmatprep.mubr.msk.bf16.mxu1 %vm1735_vm4, %v1734_v11 }
 0x1ee   :  { %1528 = vmatprep.subr.bf16.mxu1 %v1734_v11 }
 0x1f4   :  { %1519 = vmatmul.mubr.msk.bf16.vlgmr.msra.gmra.mrb[20].mxu1 %vm191_vm5, %v180_v5 }
 0x1f5   :  { %1529 = vmatpush3.bf16.xpose.msra.mxu1 %v518_v6  ;;  %1530 = vmatprep.mubr.msk.bf16.mxu1 %vm1735_vm4, %v1734_v11 }
 0x1f6   :  { %1540 = vmatprep.subr.bf16.mxu1 %v1734_v11 }
 0x1fc   :  { %1531 = vmatmul.mubr.msk.bf16.vlgmr.msra.gmra.mrb[24].mxu1 %vm191_vm5, %v182_v8 }
 0x1fd   :  { %1541 = vmatpush3.bf16.msra.mxu1 %v704_v9  ;;  %1542 = vmatprep.mubr.msk.bf16.mxu1 %vm1735_vm4, %v1734_v11 }
 0x1fe   :  { %1552 = vmatprep.subr.bf16.mxu1 %v1734_v11 }
 0x23c   :  { %v232_v10 = vpop.f32.mrb[0].mxu1 }
 0x23d   :  { %v1490_v12 = vpop.f32.mrb[1].mxu1  ;;  %v560_v13 = vsel %vm191_vm5, %v232_v10, -inf }
 0x23e   :  { %561 = vmax.xlane.f32.xlu0 %v560_v13  ;;  %v235_v14 = vpop.f32.mrb[2].mxu1 }
 0x23f   :  { %v1491_v15 = vpop.f32.mrb[3].mxu1 }
 0x244   :  { %v278_v16 = vpop.f32.mrb[4].mxu1 }
 0x245   :  { %v1496_v17 = vpop.f32.mrb[5].mxu1  ;;  %v563_v18 = vsel %vm191_vm5, %v278_v16, -inf }
 0x246   :  { %564 = vmax.xlane.f32.xlu1 %v563_v18  ;;  %v281_v19 = vpop.f32.mrb[6].mxu1 }
 0x247   :  { %v1497_v20 = vpop.f32.mrb[7].mxu1 }
 0x2af   :  { %v324_v21 = vpop.f32.mrb[8].mxu1 }
 0x2b0   :  { %v1502_v22 = vpop.f32.mrb[9].mxu1  ;;  %v566_v24 = vsel %vm191_vm5, %v324_v21, -inf }
 0x2b1   :  { %567 = vmax.xlane.f32.xlu0 %v566_v24  ;;  %v327_v25 = vpop.f32.mrb[10].mxu1 }
 0x2b2   :  { %v1503_v26 = vpop.f32.mrb[11].mxu1 }
 0x2b3   :  { %v508_v27 = vpop.f32.mrb[4].mxu0 }
 0x2b4   :  { %v1526_v28 = vpop.f32.mrb[5].mxu0  ;;  %v578_v43 = vsel %vm191_vm5, %v508_v27, -inf }
 0x2b5   :  { %v511_v29 = vpop.f32.mrb[6].mxu0 }
 0x2b6   :  { %v1527_v30 = vpop.f32.mrb[7].mxu0 }
 0x2b7   :  { %v370_v31 = vpop.f32.mrb[12].mxu1 }
 0x2b8   :  { %v1508_v33 = vpop.f32.mrb[13].mxu1  ;;  %v569_v35 = vsel %vm191_vm5, %v370_v31, -inf }
 0x2b9   :  { %570 = vmax.xlane.f32.xlu0 %v569_v35  ;;  %v373_v36 = vpop.f32.mrb[14].mxu1 }
 0x2ba   :  { %v1509_v37 = vpop.f32.mrb[15].mxu1 }
 0x2bf   :  { %v416_v38 = vpop.f32.mrb[16].mxu1 }
 0x2c0   :  { %v1514_v39 = vpop.f32.mrb[17].mxu1  ;;  %v572_v40 = vsel %vm191_vm5, %v416_v38, -inf }
 0x2c1   :  { %573 = vmax.xlane.f32.xlu1 %v572_v40  ;;  %v419_v41 = vpop.f32.mrb[18].mxu1 }
 0x2c2   :  { %v1515_v42 = vpop.f32.mrb[19].mxu1 }
 0x2c5   :  { %579 = vmax.xlane.f32.xlu1 %v578_v43 }
 0x2c7   :  { %v462_v45 = vpop.f32.mrb[20].mxu1 }
 0x2c8   :  { %v1520_v46 = vpop.f32.mrb[21].mxu1  ;;  %v575_v47 = vsel %vm191_vm5, %v462_v45, -inf }
 0x2c9   :  { %576 = vmax.xlane.f32.xlu0 %v575_v47  ;;  %v465_v48 = vpop.f32.mrb[22].mxu1  ;;  %v749_v46 = vsel %vm68_vm0, %v1877_v44, 0 }
 0x2ca   :  { %v1521_v51 = vpop.f32.mrb[23].mxu1 }
 0x2cb   :  { %v562_v52 = vpop.xlane.xlu0 %561 }
 0x2cc   :  { %v584_v53 = vsub.f32 %v232_v10, %v562_v52  ;;  %v794_v52 = vsel %vm68_vm0, %v1884_v50, 0 }
 0x2ce   :  { %v592_v54 = vmul.f32 1.442695, %v584_v53 }
 0x2cf   :  { %v554_v55 = vpop.f32.mrb[24].mxu1 }
 0x2d0   :  { %1669 = vpow2.f32 %v592_v54  ;;  %v1532_v56 = vpop.f32.mrb[25].mxu1  ;;  %v581_v58 = vsel %vm191_vm5, %v554_v55, -inf }
 0x2d1   :  { %582 = vmax.xlane.f32.xlu0 %v581_v58  ;;  %v557_v59 = vpop.f32.mrb[26].mxu1  ;;  %v839_v58 = vsel %vm68_vm0, %v1895_v57, 0 }
 0x2d2   :  { %v1533_v60 = vpop.f32.mrb[27].mxu1 }
 0x2d3   :  { %v565_v61 = vpop.xlane.xlu1 %564 }
 0x2d4   :  { %v585_v62 = vsub.f32 %v278_v16, %v565_v61 }
 0x2d6   :  { %v594_v0 = vmul.f32 1.442695, %v585_v62 }
 0x2d8   :  { %1671 = vpow2.f32 %v594_v0  ;;  %v884_v0 = vsel %vm68_vm0, %v1908_v63, 0 }
 0x2da   :  { %v1670_v1 = vpop.eup %1669 }
 0x2db   :  { %v608_v2 = vsel %vm191_vm5, %v1670_v1, 0.0 }
 0x2dc   :  { %609 = vadd.xlane.f32.xlu1 %v608_v2 }
 0x2e2   :  { %v1672_v3 = vpop.eup %1671 }
 0x2e3   :  { %v611_v5 = vsel %vm191_vm5, %v1672_v3, 0.0 }
 0x2e4   :  { %612 = vadd.xlane.f32.xlu0 %v611_v5 }
 0x33e   :  { %v568_v6 = vpop.xlane.xlu0 %567 }
 0x33f   :  { %v586_v7 = vsub.f32 %v324_v21, %v568_v6  ;;  %v929_v6 = vsel %vm68_vm0, %v1881_v49, 0  ;;  %v974_v49 = vsel %vm68_vm0, %v1916_v4, 0 }
 0x341   :  { %v596_v8 = vmul.f32 1.442695, %v586_v7 }
 0x343   :  { %1673 = vpow2.f32 %v596_v8 }
 0x346   :  { %v571_v9 = vpop.xlane.xlu0 %570 }
 0x347   :  { %v587_v10 = vsub.f32 %v370_v31, %v571_v9 }
 0x349   :  { %v598_v12 = vmul.f32 1.442695, %v587_v10 }
 0x34b   :  { %1675 = vpow2.f32 %v598_v12 }
 0x34d   :  { %v1674_v13 = vpop.eup %1673 }
 0x34e   :  { %v574_v14 = vpop.xlane.xlu1 %573  ;;  %v614_v15 = vsel %vm191_vm5, %v1674_v13, 0.0 }
 0x34f   :  { %v588_v16 = vsub.f32 %v416_v38, %v574_v14  ;;  %615 = vadd.xlane.f32.xlu1 %v614_v15 }
 0x351   :  { %v600_v17 = vmul.f32 1.442695, %v588_v16 }
 0x352   :  { %v580_v18 = vpop.xlane.xlu1 %579 }
 0x353   :  { %1677 = vpow2.f32 %v600_v17  ;;  %v590_v19 = vsub.f32 %v508_v27, %v580_v18 }
 0x355   :  { %v1676_v20 = vpop.eup %1675  ;;  %v604_v22 = vmul.f32 1.442695, %v590_v19 }
 0x356   :  { %v577_v24 = vpop.xlane.xlu0 %576  ;;  %v617_v21 = vsel %vm191_vm5, %v1676_v20, 0.0 }
 0x357   :  { %1679 = vpow2.f32 %v604_v22  ;;  %v589_v25 = vsub.f32 %v462_v45, %v577_v24  ;;  %618 = vadd.xlane.f32.xlu0 %v617_v21 }
 0x359   :  { %v602_v26 = vmul.f32 1.442695, %v589_v25 }
 0x35b   :  { %1681 = vpow2.f32 %v602_v26 }
 0x35d   :  { %v1942_v28 = vpop.eup %1677 }
 0x35e   :  { %v583_v29 = vpop.xlane.xlu0 %582  ;;  %v620_v30 = vsel %vm191_vm5, %v1942_v28, 0.0 }
 0x35f   :  { %v591_v31 = vsub.f32 %v554_v55, %v583_v29  ;;  %621 = vadd.xlane.f32.xlu1 %v620_v30 }
 0x361   :  { %v1946_v33 = vpop.eup %1679  ;;  %v606_v27 = vmul.f32 1.442695, %v591_v31 }
 0x362   :  { %v626_v35 = vsel %vm191_vm5, %v1946_v33, 0.0 }
 0x363   :  { %1683 = vpow2.f32 %v606_v27  ;;  %627 = vadd.xlane.f32.xlu1 %v626_v35 }
 0x365   :  { %v1950_v36 = vpop.eup %1681 }
 0x366   :  { %v623_v37 = vsel %vm191_vm5, %v1950_v36, 0.0 }
 0x367   :  { %624 = vadd.xlane.f32.xlu0 %v623_v37 }
 0x369   :  { %v610_v38 = vpop.xlane.xlu1 %609 }
 0x36a   :  { %1685 = vrcp.f32 %v610_v38 }
 0x36d   :  { %v1954_v39 = vpop.eup %1683 }
 0x36e   :  { %v629_v40 = vsel %vm191_vm5, %v1954_v39, 0.0 }
 0x36f   :  { %630 = vadd.xlane.f32.xlu0 %v629_v40  ;;  %v1662_v40 = vld [vmem:[%s2092_s3 + $0x8] sm:$0xff]  }
 0x371   :  { %v613_v41 = vpop.xlane.xlu0 %612 }
 0x372   :  { %1687 = vrcp.f32 %v613_v41 }
 0x374   :  { %v1686_v42 = vpop.eup %1685 }
 0x375   :  { %v633_v43 = vmul.f32 %v1686_v42, %v1670_v1 }
 0x377   :  { %v648_v45 = vpack.c.bf16 %v633_v43, %v633_v43 }
 0x379   :  { %1537 = vmatmul.mubr.msk.bf16.vlgmr.msra.gmra.mrb[8].mxu0 %vm191_vm5, %v648_v45 }
 0x37a   :  { %1547 = vmatpush3.bf16.msra.mxu0 %v749_v46  ;;  %1548 = vmatprep.mubr.msk.bf16.mxu0 %vm1735_vm4, %v1734_v11 }
 0x37b   :  { %1558 = vmatprep.subr.bf16.mxu0 %v1734_v11 }
 0x37c   :  { %v1688_v47 = vpop.eup %1687 }
 0x37d   :  { %v635_v48 = vmul.f32 %v1688_v47, %v1672_v3 }
 0x37f   :  { %v649_v51 = vpack.c.bf16 %v635_v48, %v635_v48 }
 0x381   :  { %1543 = vmatmul.mubr.msk.bf16.vlgmr.msra.gmra.mrb[28].mxu1 %vm191_vm5, %v649_v51 }
 0x382   :  { %1553 = vmatpush3.bf16.msra.mxu1 %v794_v52  ;;  %1554 = vmatprep.mubr.msk.bf16.mxu1 %vm1735_vm4, %v1734_v11 }
 0x383   :  { %1564 = vmatprep.subr.bf16.mxu1 %v1734_v11 }
 0x3dc   :  { %v616_v44 = vpop.xlane.xlu1 %615 }
 0x3dd   :  { %1689 = vrcp.f32 %v616_v44 }
 0x3e4   :  { %v619_v53 = vpop.xlane.xlu0 %618 }
 0x3e5   :  { %1691 = vrcp.f32 %v619_v53 }
 0x3e7   :  { %v1690_v54 = vpop.eup %1689 }
 0x3e8   :  { %v637_v55 = vmul.f32 %v1690_v54, %v1674_v13 }
 0x3ea   :  { %v650_v56 = vpack.c.bf16 %v637_v55, %v637_v55 }
 0x3ec   :  { %1549 = vmatmul.mubr.msk.bf16.vlgmr.msra.gmra.mrb[12].mxu0 %vm191_vm5, %v650_v56  ;;  %v622_v59 = vpop.xlane.xlu1 %621 }
 0x3ed   :  { %1559 = vmatpush3.bf16.msra.mxu0 %v839_v58  ;;  %1693 = vrcp.f32 %v622_v59  ;;  %1560 = vmatprep.mubr.msk.bf16.mxu0 %vm1735_vm4, %v1734_v11 }
 0x3ee   :  { %1570 = vmatprep.subr.bf16.mxu0 %v1734_v11 }
 0x3ef   :  { %v1692_v50 = vpop.eup %1691 }
 0x3f0   :  { %v639_v60 = vmul.f32 %v1692_v50, %v1676_v20  ;;  %v628_v61 = vpop.xlane.xlu1 %627 }
 0x3f1   :  { %1695 = vrcp.f32 %v628_v61 }
 0x3f2   :  { %v651_v62 = vpack.c.bf16 %v639_v60, %v639_v60 }
 0x3f4   :  { %1555 = vmatmul.mubr.msk.bf16.vlgmr.msra.gmra.mrb[32].mxu1 %vm191_vm5, %v651_v62  ;;  %v625_v1 = vpop.xlane.xlu0 %624 }
 0x3f5   :  { %1565 = vmatpush3.bf16.msra.mxu1 %v884_v0  ;;  %1697 = vrcp.f32 %v625_v1  ;;  %1566 = vmatprep.mubr.msk.bf16.mxu1 %vm1735_vm4, %v1734_v11 }
 0x3f6   :  { %1576 = vmatprep.subr.bf16.mxu1 %v1734_v11 }
 0x3f7   :  { %v1694_v57 = vpop.eup %1693 }
 0x3f8   :  { %v641_v2 = vmul.f32 %v1694_v57, %v1942_v28 }
 0x3fa   :  { %v652_v3 = vpack.c.bf16 %v641_v2, %v641_v2 }
 0x3fb   :  { %v1696_v5 = vpop.eup %1695 }
 0x3fc   :  { %1561 = vmatmul.mubr.msk.bf16.vlgmr.msra.gmra.mrb[16].mxu0 %vm191_vm5, %v652_v3  ;;  %v631_v7 = vpop.xlane.xlu0 %630  ;;  %v645_v63 = vmul.f32 %v1696_v5, %v1946_v33 }
 0x3fd   :  { %1571 = vmatpush3.bf16.msra.mxu0 %v929_v6  ;;  %1699 = vrcp.f32 %v631_v7  ;;  %1572 = vmatprep.mubr.msk.bf16.mxu0 %vm1735_vm4, %v1734_v11 }
 0x3fe   :  { %1582 = vmatprep.subr.bf16.mxu0 %v1734_v11  ;;  %v654_v12 = vpack.c.bf16 %v645_v63, %v645_v63 }
 0x3ff   :  { %v1698_v8 = vpop.eup %1697 }
 0x400   :  { %v643_v9 = vmul.f32 %v1698_v8, %v1950_v36  ;;  %v1661_v36 = vld [vmem:[%s2092_s3] sm:$0xff]  }
 0x402   :  { %v653_v10 = vpack.c.bf16 %v643_v9, %v643_v9  ;;  %v2019_v9 = vshrl.u32 %v33_v23, 7 }
 0x404   :  { %1567 = vmatmul.mubr.msk.bf16.vlgmr.msra.gmra.mrb[36].mxu1 %vm191_vm5, %v653_v10  ;;  %1573 = vmatmul.mubr.msk.bf16.vlgmr.msra.gmra.mrb[20].mxu0 %vm191_vm5, %v654_v12  ;;  %v1056_v10 = vsub.s32 0, %v2019_v9  ;;  %v2025_v12 = vld [vmem:[%s2095_s6] sm:$0x3f] }
 0x405   :  { %1577 = vmatpush3.bf16.msra.mxu1 %v974_v49  ;;  %1578 = vmatprep.mubr.msk.bf16.mxu1 %vm1735_vm4, %v1734_v11 }
 0x406   :  { %1586 = vmatprep.mubr.msk.bf16.mxu0 %vm1735_vm4, %v1734_v11  ;;  %1590 = vmatprep.subr.bf16.mxu1 %v1734_v11  ;;  %v1057_v49 = vrot.slane %v2025_v12, %v1056_v10 }
 0x407   :  { %v1700_v13 = vpop.eup %1699  ;;  %1583 = vmatpush3.bf16.msra.mxu0 %v1661_v36 }
 0x408   :  { %v647_v14 = vmul.f32 %v1700_v13, %v1954_v39  ;;  %1584 = vmatprep.subr.bf16.mxu0 %v1734_v11 }
 0x40a   :  { %v655_v15 = vpack.c.bf16 %v647_v14, %v647_v14 }
 0x40b   :  { %1585 = vmatpush3.bf16.msra.mxu0 %v1662_v40 }
 0x40c   :  { %1579 = vmatmul.mubr.msk.bf16.vlgmr.msra.gmra.mrb[40].mxu1 %vm191_vm5, %v655_v15  ;;  %1598 = vmatprep.subr.bf16.mxu0 %v1734_v11 }
 0x40d   :  { %1594 = vmatprep.mubr.msk.bf16.mxu1 %vm1735_vm4, %v1734_v11 }
 0x44c   :  { %v695_v16 = vpop.f32.mrb[8].mxu0 }
 0x44d   :  { %v1538_v4 = vpop.f32.mrb[9].mxu0 }
 0x44e   :  { %v698_v17 = vpop.f32.mrb[10].mxu0 }
 0x44f   :  { %v1539_v18 = vpop.f32.mrb[11].mxu0 }
 0x454   :  { %v740_v19 = vpop.f32.mrb[28].mxu1 }
 0x455   :  { %v1544_v20 = vpop.f32.mrb[29].mxu1 }
 0x456   :  { %v743_v22 = vpop.f32.mrb[30].mxu1 }
 0x457   :  { %v1545_v24 = vpop.f32.mrb[31].mxu1 }
 0x4bf   :  { %v785_v21 = vpop.f32.mrb[12].mxu0 }
 0x4c0   :  { %v1550_v25 = vpop.f32.mrb[13].mxu0 }
 0x4c1   :  { %v788_v26 = vpop.f32.mrb[14].mxu0 }
 0x4c2   :  { %v1551_v28 = vpop.f32.mrb[15].mxu0 }
 0x4c7   :  { %v830_v29 = vpop.f32.mrb[32].mxu1 }
 0x4c8   :  { %v1646_v30 = vpack.i.bf16 %v830_v29, %v785_v21  ;;  %v1556_v31 = vpop.f32.mrb[33].mxu1 }
 0x4c9   :  { %v833_v33 = vpop.f32.mrb[34].mxu1 }
 0x4ca   :  { %1647 = vrot.lane.b32.xlu1 %v1646_v30, %s1739_s15  ;;  %v1557_v27 = vpop.f32.mrb[35].mxu1  ;;  %v1664_v33 = vld [vmem:[%s2093_s4 + $0x8] sm:$0xff]  }
 0x4cb   :  { %v1665_v27 = vld [vmem:[%s2094_s5] sm:$0xff]  }
 0x4cf   :  { %v875_v35 = vpop.f32.mrb[16].mxu0 }
 0x4d0   :  { %v1562_v37 = vpop.f32.mrb[17].mxu0 }
 0x4d1   :  { %v878_v38 = vpop.f32.mrb[18].mxu0 }
 0x4d2   :  { %v1563_v39 = vpop.f32.mrb[19].mxu0 }
 0x4d7   :  { %v920_v41 = vpop.f32.mrb[36].mxu1  ;;  %v965_v42 = vpop.f32.mrb[20].mxu0 }
 0x4d8   :  { %v1651_v43 = vpack.i.bf16 %v920_v41, %v875_v35  ;;  %v1568_v45 = vpop.f32.mrb[37].mxu1  ;;  %v1574_v46 = vpop.f32.mrb[21].mxu0  ;;  %v1666_v35 = vld [vmem:[%s2094_s5 + $0x8] sm:$0xff]  }
 0x4d9   :  { %v923_v47 = vpop.f32.mrb[38].mxu1  ;;  %v968_v48 = vpop.f32.mrb[22].mxu0  ;;  %v1152_v45 = vsub.s32 2, %v2019_v9 }
 0x4da   :  { %v1575_v51 = vpop.f32.mrb[23].mxu0  ;;  %1652 = vrot.lane.b32.xlu0 %v1651_v43, %s1740_s20  ;;  %v1569_v52 = vpop.f32.mrb[39].mxu1 }
 0x4df   :  { %v1010_v44 = vpop.f32.mrb[40].mxu1 }
 0x4e0   :  { %v1656_v53 = vpack.i.bf16 %v1010_v44, %v965_v42  ;;  %v1580_v54 = vpop.f32.mrb[41].mxu1  ;;  %v1146_v42 = vsub.s32 1, %v2019_v9  ;;  %v1153_v44 = vrot.slane %v2025_v12, %v1152_v45 }
 0x4e1   :  { %v1013_v55 = vpop.f32.mrb[42].mxu1 }
 0x4e2   :  { %1657 = vrot.lane.b32.xlu1 %v1656_v53, %s1741_s21  ;;  %v1581_v56 = vpop.f32.mrb[43].mxu1  ;;  %v1147_v43 = vrot.slane %v2025_v12, %v1146_v42 }
 0x53c   :  { %v1648_v58 = vpop.permute.xlu1 %1647 }
 0x53d   :  { %v1650_v50 = vunpack.i.h.bf16 %v1648_v58  ;;  %v1649_v60 = vunpack.i.l.bf16 %v1648_v58  ;;  %v1667_v58 = vld [vmem:[%s2094_s5 + $0x10] sm:$0xff]  }
 0x53f   :  { %v1041_v1 = vsel %vm191_vm5, %v740_v19, %v1650_v50  ;;  %v1040_v57 = vsel %vm191_vm5, %v695_v16, %v1649_v60  ;;  %v1390_v50 = vld [vmem:[%s2096_s7] ss:$0 sm:$0xff] }
 0x54c   :  { %v1653_v59 = vpop.permute.xlu0 %1652 }
 0x54d   :  { %v1655_v61 = vunpack.i.h.bf16 %v1653_v59  ;;  %v1654_v62 = vunpack.i.l.bf16 %v1653_v59  ;;  %v1668_v59 = vld [vmem:[%s2094_s5 + $0x18] sm:$0xff]   ;;  %s1742_s5 = smov [#allocation2]  }
 0x54e   :  { %s1355_s7 = sshll.u32 %s1742_s5, 4  ;;  %s1356_s7 = int_to_ptr.vmem [resolvable:$true] %s1355_s7 }
 0x54f   :  { %v1044_v5 = vsel %vm1042_vm6, %v1041_v1, %v1655_v61  ;;  %v1043_v6 = vsel %vm1042_vm6, %v1040_v57, %v1654_v62  ;;  %s1709_s1 = scalar_lea.vmem %s1356_s7, 256  ;;  %p1714_p1 = scmp.lt.s32.totalorder %s1356_s7, %s1356_s7 }
 0x550   :  { %p1710_p0 = scmp.ne.s32.totalorder %s1356_s7, %s1709_s1  ;;  %p1715_p2 = scmp.lt.s32.totalorder %s1709_s1, %s1709_s1 }
 0x552   :  { %p1716_p3 = por %p1715_p2, %p1714_p1 }
 0x554   :  { %v1658_v0 = vpop.permute.xlu1 %1657  ;;  %p1717_p4 = pnand %p1716_p3, %p1710_p0 }
 0x555   :  { %v1660_v2 = vunpack.i.h.bf16 %v1658_v0  ;;  %v1659_v3 = vunpack.i.l.bf16 %v1658_v0 }
 0x557   :  { %v1047_v7 = vsel %vm1045_vm7, %v1044_v5, %v1660_v2  ;;  %v1046_v63 = vsel %vm1045_vm7, %v1043_v6, %v1659_v3 }
 0x558   :  { %v1049_v8 = vpack.c.bf16 %v1047_v7, %v1046_v63 }
 0x55a   :  { %1587 = vmatmul.mubr.msk.bf16.vlgmr.msra.gmra.mrb[24].mxu0 %vm1070_vm8, %v1049_v8 }
 0x55b   :  { %1606 = vmatprep.mubr.msk.bf16.mxu0 %vm1735_vm4, %v1734_v11  ;;  %1599 = vmatpush3.bf16.msra.mxu0 %v1665_v27  ;;  %v1344_v27 = vsub.s32 5, %v2019_v9 }
 0x55c   :  { %1600 = vmatprep.subr.bf16.mxu0 %v1734_v11 }
 0x55f   :  { %1601 = vmatpush3.bf16.msra.mxu0 %v1666_v35 }
 0x560   :  { %1602 = vmatprep.subr.bf16.mxu0 %v1734_v11 }
 0x563   :  { %1603 = vmatpush3.bf16.msra.mxu0 %v1667_v58 }
 0x564   :  { %1604 = vmatprep.subr.bf16.mxu0 %v1734_v11 }
 0x567   :  { %1605 = vmatpush3.bf16.msra.mxu0 %v1668_v59 }
 0x62d   :  { %v1108_v13 = vpop.f32.mrb[24].mxu0 }
 0x62e   :  { %v1109_v14 = vadd.f32 %v1108_v13, %v1057_v49  ;;  %v1588_v15 = vpop.f32.mrb[25].mxu0 }
 0x62f   :  { %v1111_v16 = vpop.f32.mrb[26].mxu0 }
 0x630   :  { %v1112_v4 = vadd.f32 %v1111_v16, %v1057_v49  ;;  %v1589_v17 = vpop.f32.mrb[27].mxu0  ;;  %v1115_v18 = vadd.f32 %v1109_v14, %v1848_v32 }
 0x632   :  { %v1117_v23 = vsel %vm1070_vm8, %v1115_v18, 0.0  ;;  %v1116_v19 = vadd.f32 %v1112_v4, %v1854_v34  ;;  %v1663_v34 = vld [vmem:[%s2093_s4] sm:$0xff]  }
 0x633   :  { %1118 = vadd.xlane.f32.xlu1 %v1117_v23  ;;  %1591 = vmatpush3.bf16.msra.mxu1 %v1663_v34 }
 0x634   :  { %v1120_v20 = vsel %vm1070_vm8, %v1116_v19, 0.0  ;;  %1592 = vmatprep.subr.bf16.mxu1 %v1734_v11  ;;  %v1237_v11 = vsub.s32 3, %v2019_v9 }
 0x635   :  { %1121 = vadd.xlane.f32.xlu0 %v1120_v20 }
 0x636   :  { %v1238_v6 = vrot.slane %v2025_v12, %v1237_v11 }
 0x637   :  { %1593 = vmatpush3.bf16.msra.mxu1 %v1664_v33  ;;  %v1338_v33 = vsub.s32 4, %v2019_v9 }
 0x639   :  { %v1339_v35 = vrot.slane %v2025_v12, %v1338_v33 }
 0x6c0   :  { %v1119_v22 = vpop.xlane.xlu1 %1118 }
 0x6c1   :  { %v1124_v24 = vmul.f32 0.03125, %v1119_v22 }
 0x6c2   :  { %v1122_v21 = vpop.xlane.xlu0 %1121 }
 0x6c3   :  { %v1126_v25 = vsub.f32 %v1115_v18, %v1124_v24  ;;  %v1125_v26 = vmul.f32 0.03125, %v1122_v21 }
 0x6c5   :  { %v1127_v28 = vsub.f32 %v1116_v19, %v1125_v26  ;;  %v1128_v29 = vmul.f32 %v1126_v25, %v1126_v25 }
 0x6c7   :  { %v1130_v30 = vsel %vm1070_vm8, %v1128_v29, 0.0  ;;  %v1129_v31 = vmul.f32 %v1127_v28, %v1127_v28 }
 0x6c8   :  { %1131 = vadd.xlane.f32.xlu0 %v1130_v30 }
 0x6c9   :  { %v1133_v32 = vsel %vm1070_vm8, %v1129_v31, 0.0 }
 0x6ca   :  { %1134 = vadd.xlane.f32.xlu1 %v1133_v32 }
 0x755   :  { %v1132_v36 = vpop.xlane.xlu0 %1131 }
 0x756   :  { %v1136_v37 = vmul.f32 0.03125, %v1132_v36 }
 0x757   :  { %v1135_v38 = vpop.xlane.xlu1 %1134 }
 0x758   :  { %v1138_v39 = vadd.f32 1e-05, %v1136_v37  ;;  %v1137_v40 = vmul.f32 0.03125, %v1135_v38  ;;  %v1345_v38 = vrot.slane %v2025_v12, %v1344_v27 }
 0x75a   :  { %1701 = vrsqrt.f32 %v1138_v39  ;;  %v1139_v41 = vadd.f32 1e-05, %v1137_v40 }
 0x75c   :  { %1703 = vrsqrt.f32 %v1139_v41 }
 0x764   :  { %v1702_v46 = vpop.eup %1701 }
 0x765   :  { %v1142_v47 = vmul.f32 %v1702_v46, %v1126_v25 }
 0x766   :  { %v1704_v48 = vpop.eup %1703 }
 0x767   :  { %v1148_v51 = vmul.f32 %v1147_v43, %v1142_v47  ;;  %v1143_v52 = vmul.f32 %v1704_v48, %v1127_v28 }
 0x769   :  { %v1149_v53 = vmul.f32 %v1147_v43, %v1143_v52  ;;  %v1154_v54 = vadd.f32 %v1153_v44, %v1148_v51 }
 0x76b   :  { %v1155_v55 = vadd.f32 %v1153_v44, %v1149_v53 }
 0x76d   :  { %v1156_v56 = vpack.c.bf16 %v1155_v55, %v1154_v54 }
 0x76f   :  { %1595 = vmatmul.mubr.msk.bf16.vlgmr.msra.gmra.mrb[44].mxu1 %vm1070_vm8, %v1156_v56 }
 0x842   :  { %v1217_v60 = vpop.f32.mrb[44].mxu1 }
 0x843   :  { %v1218_v61 = vadd.f32 %v1390_v50, %v1217_v60  ;;  %v1596_v62 = vpop.f32.mrb[45].mxu1 }
 0x844   :  { %v1220_v0 = vpop.f32.mrb[46].mxu1 }
 0x845   :  { %v1221_v1 = vadd.f32 %v1390_v50, %v1220_v0  ;;  %v1597_v57 = vpop.f32.mrb[47].mxu1  ;;  %v1224_v2 = vmax.f32 %v1218_v61, 0.0 }
 0x847   :  { %v1225_v3 = vmax.f32 %v1221_v1, 0.0 }
 0x849   :  { %v1226_v5 = vpack.c.bf16 %v1225_v3, %v1224_v2 }
 0x84b   :  { %1607 = vmatmul.mubr.msk.bf16.vlgmr.msra.gmra.mrb[28].mxu0 %vm1263_vm9, %v1226_v5 }
 0x91e   :  { %v1301_v7 = vpop.f32.mrb[28].mxu0 }
 0x91f   :  { %v1302_v63 = vadd.f32 %v1301_v7, %v1238_v6  ;;  %v1608_v8 = vpop.f32.mrb[29].mxu0 }
 0x920   :  { %v1304_v10 = vpop.f32.mrb[30].mxu0 }
 0x921   :  { %v1305_v49 = vadd.f32 %v1304_v10, %v1238_v6  ;;  %v1609_v13 = vpop.f32.mrb[31].mxu0  ;;  %v1308_v14 = vadd.f32 %v1302_v63, %v1154_v54 }
 0x923   :  { %v1310_v15 = vsel %vm1070_vm8, %v1308_v14, 0.0  ;;  %v1309_v16 = vadd.f32 %v1305_v49, %v1155_v55 }
 0x924   :  { %1311 = vadd.xlane.f32.xlu0 %v1310_v15 }
 0x925   :  { %v1313_v4 = vsel %vm1070_vm8, %v1309_v16, 0.0 }
 0x926   :  { %1314 = vadd.xlane.f32.xlu1 %v1313_v4 }
 0x9b1   :  { %v1312_v17 = vpop.xlane.xlu0 %1311 }
 0x9b2   :  { %v1316_v18 = vmul.f32 0.03125, %v1312_v17 }
 0x9b3   :  { %v1315_v23 = vpop.xlane.xlu1 %1314 }
 0x9b4   :  { %v1318_v19 = vsub.f32 %v1308_v14, %v1316_v18  ;;  %v1317_v20 = vmul.f32 0.03125, %v1315_v23 }
 0x9b6   :  { %v1319_v22 = vsub.f32 %v1309_v16, %v1317_v20  ;;  %v1320_v24 = vmul.f32 %v1318_v19, %v1318_v19 }
 0x9b8   :  { %v1322_v21 = vsel %vm1070_vm8, %v1320_v24, 0.0  ;;  %v1321_v25 = vmul.f32 %v1319_v22, %v1319_v22 }
 0x9b9   :  { %1323 = vadd.xlane.f32.xlu0 %v1322_v21 }
 0x9ba   :  { %v1325_v26 = vsel %vm1070_vm8, %v1321_v25, 0.0 }
 0x9bb   :  { %1326 = vadd.xlane.f32.xlu1 %v1325_v26 }
 0xa46   :  { %v1324_v28 = vpop.xlane.xlu0 %1323 }
 0xa47   :  { %v1328_v29 = vmul.f32 0.03125, %v1324_v28 }
 0xa48   :  { %v1327_v30 = vpop.xlane.xlu1 %1326 }
 0xa49   :  { %v1330_v31 = vadd.f32 1e-05, %v1328_v29  ;;  %v1329_v32 = vmul.f32 0.03125, %v1327_v30 }
 0xa4b   :  { %1705 = vrsqrt.f32 %v1330_v31  ;;  %v1331_v34 = vadd.f32 1e-05, %v1329_v32 }
 0xa4d   :  { %1707 = vrsqrt.f32 %v1331_v34 }
 0xa55   :  { %v1706_v36 = vpop.eup %1705 }
 0xa56   :  { %v1334_v37 = vmul.f32 %v1706_v36, %v1318_v19 }
 0xa57   :  { %v1708_v39 = vpop.eup %1707 }
 0xa58   :  { %v1335_v40 = vmul.f32 %v1708_v39, %v1319_v22  ;;  %v1340_v41 = vmul.f32 %v1339_v35, %v1334_v37 }
 0xa5a   :  { %v1341_v42 = vmul.f32 %v1339_v35, %v1335_v40  ;;  %v1346_v43 = vadd.f32 %v1345_v38, %v1340_v41 }
 0xa5c   :  { %v1347_v45 = vadd.f32 %v1345_v38, %v1341_v42  ;;  %1348 = vst.msk [vmem:[#allocation2] sm:$0xff] %vm1070_vm8, %v1346_v43 }
 0xa5e   :  { %1349 = vst.msk [vmem:[#allocation2 + $0x8] sm:$0xff] %vm1070_vm8, %v1347_v45 }
 0xa5f   :  { %1720 = shalt.err (!%p1717_p4)
}
 0xa60   :  { %s1721_s14 = scalar_lea.hbm %s2097_s8, 256 }
 0xa61   :  { %p1722_p5 = scmp.ne.s32.totalorder %s2097_s8, %s1721_s14  ;;  %p1725_p6 = scmp.lt.u32.totalorder %s1721_s14, %s2097_s8 }
 0xa63   :  { %p1727_p7 = pnand %p1725_p6, %p1722_p5 }
 0xa65   :  { %1730 = shalt.err (!%p1727_p7)
}
 0xa66   :  { %s1743_s19 = smov 128  }
 0xa67   :  { %1361 = dma.vmem_to_hbm [thread:$0]  %s1356_s7, 256, %s2097_s8, [#allocation3], %s1743_s19, %s1743_s19, %s1739_s15  }
 0xa68   :  { %1731 = dma.done.wait [#allocation3], 256  }
 0xa69   :  { %1732 = vsyncadd [#allocation3], 4294967040 }
 0xa6a   :  { %1365 = vsyncpa [#allocation3], 1 }

</bundles_post_ra>
